<compile_context>
chip_gen: v7x
topology: tpu7x:2x2x1
jax: 0.10.0
libtpu: 0.0.40
codegen_flags: <defaults>
</compile_context>

<pallas_src>
import jax
import jax.numpy as jnp
from jax.experimental import pallas as pl
from jax.experimental.pallas import tpu as pltpu

INPUT_DIM = 200     # fc1 in_features (constructor arg `input_dims` of Actor)
FC1_DIMS = 128
FC2_DIMS = 128
N_ACTIONS = 2
LANE = 128          # lane width; mu output columns are padded up to this


def actor_kernel(state_ref, w1_ref, b1_ref, w2_ref, b2_ref,
                 wmu_ref, bmu_ref, out_ref):
    # fc1 + relu : (TM, D) @ (D, 128), bf16 operands, f32 MXU accumulation.
    h = jnp.dot(state_ref[...], w1_ref[...],
                preferred_element_type=jnp.float32)
    h = jnp.maximum(h + b1_ref[...], 0.0)                       # f32 VPU

    # fc2 + relu : (TM, 128) @ (128, 128) on the MXU.
    h = jnp.dot(h.astype(w2_ref.dtype), w2_ref[...],
                preferred_element_type=jnp.float32)
    h = jnp.maximum(h + b2_ref[...], 0.0)                       # f32 VPU

    # mu + sigmoid : third MXU matmul against the lane-padded (128, 128)
    # Wmu^T (real weights in the first 2 columns, zeros elsewhere), giving a
    # lane-dense (TM, 128) output block; the wrapper slices [:, :2].
    logits = jnp.dot(h.astype(wmu_ref.dtype), wmu_ref[...],
                     preferred_element_type=jnp.float32) + bmu_ref[...]
    out_ref[...] = 1.0 / (1.0 + jnp.exp(-logits))                # sigmoid (EUP exp)


def _round_up(x, m):
    return ((x + m - 1) // m) * m


def actor_forward(state, params, *, block_b=512, compute_dtype=jnp.bfloat16):
    """Actor forward pass via a single pallas_call with a batch grid.

    block_b: max rows of `state` processed per grid step.  The batch tile is
    the MXU streaming (M) dimension, so large values (512-1024) are fine on
    every generation; VMEM use at tm=1024 is only a few MiB.
    """
    w1, b1, w2, b2, wmu, bmu = params
    B, D = state.shape
    H1 = w1.shape[1]
    H2 = w2.shape[1]
    A = wmu.shape[0]
    n_pad = max(LANE, _round_up(A, LANE))   # lane-dense output width

    # bf16 storage for matmul operands; biases stay f32 (VPU math in f32).
    w1_c = w1.astype(compute_dtype)
    w2_c = w2.astype(compute_dtype)
    # mu: transpose to (in, out) and zero-pad the 2 output columns to a full
    # 128-lane slab so the last layer is a plain MXU matmul.
    wmu_c = jnp.zeros((H2, n_pad), compute_dtype).at[:, :A].set(
        wmu.T.astype(compute_dtype))
    bmu_c = jnp.zeros((1, n_pad), jnp.float32).at[:, :A].set(bmu)

    # Batch tiling: never pad to a full tile.  A batch that fits one
    # full-extent block needs no padding; otherwise pad only to the 8-row
    # sublane multiple (<= 7 extra rows).  A trailing partial grid block is
    # allowed: its input rows are undefined and its output rows are sliced
    # off below (no reduction crosses rows).
    if B <= 8:
        b_pad = B
        tm = B
    else:
        b_pad = _round_up(B, 8)
        # >= 2 grid steps whenever possible so the "parallel" axis shards
        # across both TensorCores on v7x; cap at block_b.
        tm = min(block_b, _round_up(pl.cdiv(b_pad, 2), 8))
    state_c = state.astype(compute_dtype)
    if b_pad != B:
        state_c = jnp.pad(state_c, ((0, b_pad - B), (0, 0)))
    n_steps = pl.cdiv(b_pad, tm)

    pinned = lambda i: (0, 0)   # parameters resident in VMEM across grid steps

    # Extra in-flight state DMA only pays off once there are several grid
    # steps; VMEM headroom is ample even on v7x (64 MiB).
    state_spec_kwargs = {}
    if n_steps >= 3:
        state_spec_kwargs["pipeline_mode"] = pl.Buffered(3)
    state_spec = pl.BlockSpec((tm, D), lambda i: (i, 0), **state_spec_kwargs)

    out = pl.pallas_call(
        actor_kernel,
        out_shape=jax.ShapeDtypeStruct((b_pad, n_pad), jnp.float32),
        grid_spec=pltpu.PrefetchScalarGridSpec(
            num_scalar_prefetch=0,
            grid=(n_steps,),
            in_specs=[
                state_spec,                                # state: tiled over batch
                pl.BlockSpec((D, H1), pinned),             # w1  (in, out)
                pl.BlockSpec((1, H1), pinned),             # b1  (f32)
                pl.BlockSpec((H1, H2), pinned),            # w2  (in, out)
                pl.BlockSpec((1, H2), pinned),             # b2  (f32)
                pl.BlockSpec((H2, n_pad), pinned),         # wmu^T, lane-padded
                pl.BlockSpec((1, n_pad), pinned),          # bmu, lane-padded (f32)
            ],
            out_specs=pl.BlockSpec((tm, n_pad), lambda i: (i, 0)),
        ),
        compiler_params=pltpu.CompilerParams(
            # Batch tiles are independent -> shard across TCs on v7x.
            dimension_semantics=("parallel",),
        ),
        cost_estimate=pl.CostEstimate(
            flops=2 * b_pad * (D * H1 + H1 * H2 + H2 * n_pad),
            transcendentals=b_pad * n_pad,
            bytes_accessed=(2 * (b_pad * D + D * H1 + H1 * H2 + H2 * n_pad)
                            + 4 * (H1 + H2 + n_pad)
                            + 4 * b_pad * n_pad),
        ),
    )(state_c, w1_c, b1, w2_c, b2, wmu_c, bmu_c)
    return out[:B, :A]


def init_params(key, input_dims=INPUT_DIM):
    """Mirror torch.nn.Linear's uniform(-1/sqrt(fan_in), +1/sqrt(fan_in)) init.

    fc1/fc2 weights are stored transposed as (in_features, out_features) so
    the kernel computes plain x @ W + b.  mu is kept in torch's native
    (out_features, in_features) = (2, 128) layout; the wrapper transposes and
    lane-pads it.  Biases are (1, out_features) for clean VPU broadcast.
    """
    def linear(k, fan_in, fan_out, *, transpose=True):
        kw, kb = jax.random.split(k)
        bound = 1.0 / (fan_in ** 0.5)
        w_shape = (fan_in, fan_out) if transpose else (fan_out, fan_in)
        w = jax.random.uniform(kw, w_shape, jnp.float32, -bound, bound)
        b = jax.random.uniform(kb, (1, fan_out), jnp.float32, -bound, bound)
        return w, b

    k1, k2, k3 = jax.random.split(key, 3)
    w1, b1 = linear(k1, input_dims, FC1_DIMS)                     # fc1
    w2, b2 = linear(k2, FC1_DIMS, FC2_DIMS)                       # fc2
    wmu, bmu = linear(k3, FC2_DIMS, N_ACTIONS, transpose=False)   # mu: (2, 128)
    return w1, b1, w2, b2, wmu, bmu


def actor_reference(state, params, compute_dtype=jnp.bfloat16):
    """Pure-JAX reference with the same bf16 operand storage as the kernel."""
    w1, b1, w2, b2, wmu, bmu = params
    x = state.astype(compute_dtype)
    h = jnp.dot(x, w1.astype(compute_dtype),
                preferred_element_type=jnp.float32) + b1
    h = jnp.maximum(h, 0.0)
    h = jnp.dot(h.astype(compute_dtype), w2.astype(compute_dtype),
                preferred_element_type=jnp.float32) + b2
    h = jnp.maximum(h, 0.0)
    logits = jnp.dot(h.astype(compute_dtype), wmu.T.astype(compute_dtype),
                     preferred_element_type=jnp.float32) + bmu
    return 1.0 / (1.0 + jnp.exp(-logits))


if __name__ == "__main__":
    key = jax.random.PRNGKey(0)
    kp, ks1, ks2 = jax.random.split(key, 3)
    params = init_params(kp)

    # Small batch: single full-extent block, grid=(1,), no padding at all.
    B1 = 8
    state1 = jax.random.normal(ks1, (B1, INPUT_DIM), jnp.float32)
    a1 = jax.block_until_ready(actor_forward(state1, params))
    r1 = actor_reference(state1, params)
    assert a1.shape == (B1, N_ACTIONS)
    assert bool(jnp.all(jnp.isfinite(a1)))
    assert jnp.allclose(a1, r1, atol=2e-3, rtol=2e-3), "mismatch vs reference (B=8)"

    # Non-multiple-of-8 batch: pads only 300 -> 304 rows (no full-tile pad),
    # 2-step "parallel" grid (shards across both TCs on v7x).
    B2 = 300
    state2 = jax.random.normal(ks2, (B2, INPUT_DIM), jnp.float32)
    a2 = jax.block_until_ready(actor_forward(state2, params))
    r2 = actor_reference(state2, params)
    assert a2.shape == (B2, N_ACTIONS)
    assert bool(jnp.all(jnp.isfinite(a2)))
    assert jnp.allclose(a2, r2, atol=2e-3, rtol=2e-3), "mismatch vs reference (B=300)"

    # TODO(synk): torch.optim.Adam / training step is host-side and not part of
    # the forward pass; only the forward is implemented as a kernel.
    print("KERNEL_OK")
</pallas_src>

<mosaic_0001>
module attributes {stable_mosaic.version = 11 : i64} {
  func.func @actor_kernel(%arg0: i32, %arg1: memref<8x200xbf16, #tpu.memory_space<vmem>>, %arg2: memref<200x128xbf16, #tpu.memory_space<vmem>>, %arg3: memref<1x128xf32, #tpu.memory_space<vmem>>, %arg4: memref<128x128xbf16, #tpu.memory_space<vmem>>, %arg5: memref<1x128xf32, #tpu.memory_space<vmem>>, %arg6: memref<128x128xbf16, #tpu.memory_space<vmem>>, %arg7: memref<1x128xf32, #tpu.memory_space<vmem>>, %arg8: memref<8x128xf32, #tpu.memory_space<vmem>>) attributes {dimension_semantics = [#tpu.dimension_semantics<parallel>], iteration_bounds = array<i64: 1>, scalar_prefetch = 0 : i64, scratch_operands = 0 : i64, tpu.core_type = #tpu.core_type<tc>, window_params = [{transform_indices = @transform_0, window_bounds = array<i64: 8, 200>}, {pipeline_mode = #tpu.pipeline_mode<synchronous>, transform_indices = @transform_1, window_bounds = array<i64: 200, 128>}, {pipeline_mode = #tpu.pipeline_mode<synchronous>, transform_indices = @transform_2, window_bounds = array<i64: 1, 128>}, {pipeline_mode = #tpu.pipeline_mode<synchronous>, transform_indices = @transform_3, window_bounds = array<i64: 128, 128>}, {pipeline_mode = #tpu.pipeline_mode<synchronous>, transform_indices = @transform_4, window_bounds = array<i64: 1, 128>}, {pipeline_mode = #tpu.pipeline_mode<synchronous>, transform_indices = @transform_5, window_bounds = array<i64: 128, 128>}, {pipeline_mode = #tpu.pipeline_mode<synchronous>, transform_indices = @transform_6, window_bounds = array<i64: 1, 128>}, {transform_indices = @transform_7, window_bounds = array<i64: 8, 128>}]} {
    %c0 = arith.constant 0 : index
    %c0_0 = arith.constant 0 : index
    %0 = vector.load %arg1[%c0, %c0_0] : memref<8x200xbf16, #tpu.memory_space<vmem>>, vector<8x200xbf16>
    %c0_1 = arith.constant 0 : index
    %c0_2 = arith.constant 0 : index
    %1 = vector.load %arg2[%c0_1, %c0_2] : memref<200x128xbf16, #tpu.memory_space<vmem>>, vector<200x128xbf16>
    %cst = arith.constant dense<0.000000e+00> : vector<8x128xf32>
    %2 = tpu.matmul %0, %1, %cst {dimension_numbers = #tpu.dot_dimension_numbers<[1], [0], [0], [1], [0, 0, 1, 1], [], []>} : vector<8x200xbf16>, vector<200x128xbf16>, vector<8x128xf32> -> vector<8x128xf32>
    %c0_3 = arith.constant 0 : index
    %c0_4 = arith.constant 0 : index
    %3 = vector.load %arg3[%c0_3, %c0_4] : memref<1x128xf32, #tpu.memory_space<vmem>>, vector<1x128xf32>
    %4 = vector.broadcast %3 : vector<1x128xf32> to vector<8x128xf32>
    %5 = arith.addf %2, %4 : vector<8x128xf32>
    %cst_5 = arith.constant 0.000000e+00 : f32
    %6 = vector.broadcast %cst_5 : f32 to vector<8x128xf32>
    %7 = arith.maximumf %5, %6 : vector<8x128xf32>
    %8 = arith.truncf %7 : vector<8x128xf32> to vector<8x128xbf16>
    %c0_6 = arith.constant 0 : index
    %c0_7 = arith.constant 0 : index
    %9 = vector.load %arg4[%c0_6, %c0_7] : memref<128x128xbf16, #tpu.memory_space<vmem>>, vector<128x128xbf16>
    %cst_8 = arith.constant dense<0.000000e+00> : vector<8x128xf32>
    %10 = tpu.matmul %8, %9, %cst_8 {dimension_numbers = #tpu.dot_dimension_numbers<[1], [0], [0], [1], [0, 0, 1, 1], [], []>} : vector<8x128xbf16>, vector<128x128xbf16>, vector<8x128xf32> -> vector<8x128xf32>
    %c0_9 = arith.constant 0 : index
    %c0_10 = arith.constant 0 : index
    %11 = vector.load %arg5[%c0_9, %c0_10] : memref<1x128xf32, #tpu.memory_space<vmem>>, vector<1x128xf32>
    %12 = vector.broadcast %11 : vector<1x128xf32> to vector<8x128xf32>
    %13 = arith.addf %10, %12 : vector<8x128xf32>
    %cst_11 = arith.constant 0.000000e+00 : f32
    %14 = vector.broadcast %cst_11 : f32 to vector<8x128xf32>
    %15 = arith.maximumf %13, %14 : vector<8x128xf32>
    %16 = arith.truncf %15 : vector<8x128xf32> to vector<8x128xbf16>
    %c0_12 = arith.constant 0 : index
    %c0_13 = arith.constant 0 : index
    %17 = vector.load %arg6[%c0_12, %c0_13] : memref<128x128xbf16, #tpu.memory_space<vmem>>, vector<128x128xbf16>
    %cst_14 = arith.constant dense<0.000000e+00> : vector<8x128xf32>
    %18 = tpu.matmul %16, %17, %cst_14 {dimension_numbers = #tpu.dot_dimension_numbers<[1], [0], [0], [1], [0, 0, 1, 1], [], []>} : vector<8x128xbf16>, vector<128x128xbf16>, vector<8x128xf32> -> vector<8x128xf32>
    %c0_15 = arith.constant 0 : index
    %c0_16 = arith.constant 0 : index
    %19 = vector.load %arg7[%c0_15, %c0_16] : memref<1x128xf32, #tpu.memory_space<vmem>>, vector<1x128xf32>
    %20 = vector.broadcast %19 : vector<1x128xf32> to vector<8x128xf32>
    %21 = arith.addf %18, %20 : vector<8x128xf32>
    %cst_17 = arith.constant 0.000000e+00 : f32
    %22 = vector.broadcast %cst_17 : f32 to vector<8x128xf32>
    %23 = arith.subf %22, %21 : vector<8x128xf32>
    %24 = math.exp %23 : vector<8x128xf32>
    %cst_18 = arith.constant 1.000000e+00 : f32
    %25 = vector.broadcast %cst_18 : f32 to vector<8x128xf32>
    %26 = arith.addf %25, %24 : vector<8x128xf32>
    %cst_19 = arith.constant 1.000000e+00 : f32
    %27 = vector.broadcast %cst_19 : f32 to vector<8x128xf32>
    %28 = arith.divf %27, %26 : vector<8x128xf32>
    %c0_20 = arith.constant 0 : index
    %c0_21 = arith.constant 0 : index
    %29 = vector.load %arg8[%c0_20, %c0_21] : memref<8x128xf32, #tpu.memory_space<vmem>>, vector<8x128xf32>
    tpu.vector_store %arg8[%c0_20, %c0_21], %28 {strides = array<i32>} : memref<8x128xf32, #tpu.memory_space<vmem>>, vector<8x128xf32>,
    return
  }
  func.func @transform_0(%arg0: i32) -> (i32, i32) {
    %c0_i32 = arith.constant 0 : i32
    %c0_i32_0 = arith.constant 0 : i32
    return %arg0, %c0_i32 : i32, i32
  }
  func.func @transform_1(%arg0: i32) -> (i32, i32) {
    %c0_i32 = arith.constant 0 : i32
    %c0_i32_0 = arith.constant 0 : i32
    %c0_i32_1 = arith.constant 0 : i32
    return %c0_i32, %c0_i32_0 : i32, i32
  }
  func.func @transform_2(%arg0: i32) -> (i32, i32) {
    %c0_i32 = arith.constant 0 : i32
    %c0_i32_0 = arith.constant 0 : i32
    %c0_i32_1 = arith.constant 0 : i32
    return %c0_i32, %c0_i32_0 : i32, i32
  }
  func.func @transform_3(%arg0: i32) -> (i32, i32) {
    %c0_i32 = arith.constant 0 : i32
    %c0_i32_0 = arith.constant 0 : i32
    %c0_i32_1 = arith.constant 0 : i32
    return %c0_i32, %c0_i32_0 : i32, i32
  }
  func.func @transform_4(%arg0: i32) -> (i32, i32) {
    %c0_i32 = arith.constant 0 : i32
    %c0_i32_0 = arith.constant 0 : i32
    %c0_i32_1 = arith.constant 0 : i32
    return %c0_i32, %c0_i32_0 : i32, i32
  }
  func.func @transform_5(%arg0: i32) -> (i32, i32) {
    %c0_i32 = arith.constant 0 : i32
    %c0_i32_0 = arith.constant 0 : i32
    %c0_i32_1 = arith.constant 0 : i32
    return %c0_i32, %c0_i32_0 : i32, i32
  }
  func.func @transform_6(%arg0: i32) -> (i32, i32) {
    %c0_i32 = arith.constant 0 : i32
    %c0_i32_0 = arith.constant 0 : i32
    %c0_i32_1 = arith.constant 0 : i32
    return %c0_i32, %c0_i32_0 : i32, i32
  }
  func.func @transform_7(%arg0: i32) -> (i32, i32) {
    %c0_i32 = arith.constant 0 : i32
    %c0_i32_0 = arith.constant 0 : i32
    return %arg0, %c0_i32 : i32, i32
  }
}

</mosaic_0001>

<bundles_post_ra>
// kernel: tpu_custom_call.1
= control target key start
LH: loop header
LB: loop body
LE: loop exit
PB: predicated region body
PF: predicated region fallthrough
CT: control target
= control target key end

     0   :  { %12 = vsyncpa [#allocation3], 0  ;;  %s895_s0 = inlined_call_operand.hbm [shape: bf16[8,200], index: 0, kind: input, shape index: {}]   ;;  %s896_s1 = inlined_call_operand.hbm [shape: bf16[200,128], index: 1, kind: input, shape index: {}]   ;;  %s897_s2 = inlined_call_operand.vmem [shape: f32[1,128], index: 2, kind: input, shape index: {}]   ;;  %s898_s3 = inlined_call_operand.hbm [shape: bf16[128,128], index: 3, kind: input, shape index: {}]   ;;  %s899_s4 = inlined_call_operand.vmem [shape: f32[1,128], index: 4, kind: input, shape index: {}]   ;;  %s900_s5 = inlined_call_operand.hbm [shape: bf16[128,128], index: 5, kind: input, shape index: {}]   ;;  %s901_s6 = inlined_call_operand.vmem [shape: f32[1,128], index: 6, kind: input, shape index: {}]   ;;  %s902_s7 = inlined_call_operand.hbm [shape: f32[8,128], index: 7, kind: output, shape index: {}]  }
   0x1   :  { %13 = vsyncpa [#allocation6], 0 }
   0x2   :  { %14 = vsyncpa [#allocation9], 0 }
   0x3   :  { %15 = vsyncpa [#allocation4], 0  ;;  %s749_s24 = smov [#allocation5]   ;;  %s631_s28 = scalar_lea.hbm %s896_s1, 1600 }
   0x4   :  { %s31_s25 = sshll.u32 %s749_s24, 4  ;;  %p632_p0 = scmp.ne.s32.totalorder %s896_s1, %s631_s28  ;;  %s32_s25 = int_to_ptr.vmem [resolvable:$true] %s31_s25 }
   0x5   :  { %p635_p1 = scmp.lt.u32.totalorder %s631_s28, %s896_s1 }
   0x7   :  { %p637_p2 = pnand %p635_p1, %p632_p0 }
   0x9   :  { %640 = shalt.err (!%p637_p2)
}
   0xa   :  { %s641_s10 = scalar_lea.vmem %s32_s25, 1600  ;;  %p646_p4 = scmp.lt.s32.totalorder %s32_s25, %s32_s25 }
   0xb   :  { %p642_p3 = scmp.ne.s32.totalorder %s32_s25, %s641_s10  ;;  %p647_p5 = scmp.lt.s32.totalorder %s641_s10, %s641_s10 }
   0xd   :  { %p648_p6 = por %p647_p5, %p646_p4 }
   0xf   :  { %p649_p7 = pnand %p648_p6, %p642_p3 }
  0x11   :  { %652 = shalt.err (!%p649_p7)
}
  0x12   :  { %s750_s11 = smov 64   ;;  %s751_s12 = smov 4  }
  0x13   :  { %37 = dma.hbm_to_vmem [thread:$0]  %s896_s1, 1600, %s32_s25, [#allocation6], %s750_s11, %s750_s11, %s751_s12  }
  0x14   :  { %s752_s15 = smov [#allocation2]   ;;  %s753_s17 = smov [#allocation7]  }
  0x15   :  { %s22_s16 = sshll.u32 %s752_s15, 4  ;;  %s45_s18 = sshll.u32 %s753_s17, 4  ;;  %s23_s16 = int_to_ptr.vmem [resolvable:$true] %s22_s16  ;;  %s46_s18 = int_to_ptr.vmem [resolvable:$true] %s45_s18 }
  0x16   :  { %s653_s21 = scalar_lea.hbm %s895_s0, 128 }
  0x17   :  { %p654_p8 = scmp.ne.s32.totalorder %s895_s0, %s653_s21  ;;  %p657_p9 = scmp.lt.u32.totalorder %s653_s21, %s895_s0 }
  0x19   :  { %p659_p10 = pnand %p657_p9, %p654_p8 }
  0x1b   :  { %662 = shalt.err (!%p659_p10)
}
  0x1c   :  { %s663_s1 = scalar_lea.vmem %s23_s16, 128  ;;  %p668_p12 = scmp.lt.s32.totalorder %s23_s16, %s23_s16 }
  0x1d   :  { %p664_p11 = scmp.ne.s32.totalorder %s23_s16, %s663_s1  ;;  %p669_p13 = scmp.lt.s32.totalorder %s663_s1, %s663_s1 }
  0x1f   :  { %p670_p0 = por %p669_p13, %p668_p12 }
  0x21   :  { %p671_p1 = pnand %p670_p0, %p664_p11 }
  0x23   :  { %674 = shalt.err (!%p671_p1)
}
  0x24   :  { %25 = dma.hbm_to_vmem [thread:$0]  %s895_s0, 128, %s23_s16, [#allocation3]  }
  0x25   :  { %s675_s30 = scalar_lea.hbm %s898_s3, 1024 }
  0x26   :  { %p676_p2 = scmp.ne.s32.totalorder %s898_s3, %s675_s30  ;;  %p679_p3 = scmp.lt.u32.totalorder %s675_s30, %s898_s3 }
  0x28   :  { %p681_p4 = pnand %p679_p3, %p676_p2 }
  0x2a   :  { %684 = shalt.err (!%p681_p4)
}
  0x2b   :  { %s685_s14 = scalar_lea.vmem %s46_s18, 1024  ;;  %p690_p6 = scmp.lt.s32.totalorder %s46_s18, %s46_s18 }
  0x2c   :  { %p686_p5 = scmp.ne.s32.totalorder %s46_s18, %s685_s14  ;;  %p691_p7 = scmp.lt.s32.totalorder %s685_s14, %s685_s14 }
  0x2e   :  { %p692_p8 = por %p691_p7, %p690_p6 }
  0x30   :  { %p693_p9 = pnand %p692_p8, %p686_p5 }
  0x32   :  { %696 = shalt.err (!%p693_p9)
}
  0x33   :  { %51 = dma.hbm_to_vmem [thread:$0]  %s898_s3, 1024, %s46_s18, [#allocation6], %s750_s11, %s750_s11, %s751_s12  }
  0x34   :  { %s754_s16 = smov [#allocation8]   ;;  %s697_s21 = scalar_lea.hbm %s900_s5, 1024 }
  0x35   :  { %s59_s17 = sshll.u32 %s754_s16, 4  ;;  %p698_p10 = scmp.ne.s32.totalorder %s900_s5, %s697_s21  ;;  %s60_s17 = int_to_ptr.vmem [resolvable:$true] %s59_s17 }
  0x36   :  { %p701_p11 = scmp.lt.u32.totalorder %s697_s21, %s900_s5 }
  0x38   :  { %p703_p12 = pnand %p701_p11, %p698_p10 }
  0x3a   :  { %706 = shalt.err (!%p703_p12)
}
  0x3b   :  { %s707_s1 = scalar_lea.vmem %s60_s17, 1024  ;;  %p712_p0 = scmp.lt.s32.totalorder %s60_s17, %s60_s17 }
  0x3c   :  { %p708_p13 = scmp.ne.s32.totalorder %s60_s17, %s707_s1  ;;  %p713_p1 = scmp.lt.s32.totalorder %s707_s1, %s707_s1 }
  0x3e   :  { %p714_p2 = por %p713_p1, %p712_p0 }
  0x40   :  { %p715_p3 = pnand %p714_p2, %p708_p13 }
  0x42   :  { %718 = shalt.err (!%p715_p3)
}
  0x43   :  { %65 = dma.hbm_to_vmem [thread:$0]  %s900_s5, 1024, %s60_s17, [#allocation9], %s750_s11, %s750_s11, %s751_s12  }
  0x44   :  { %741 = dma.done.wait [#allocation3], 128  }
  0x45   :  { %742 = vsyncadd [#allocation3], 4294967168 }
  0x46   :  { %743 = dma.done.wait [#allocation6], 2624  }
  0x47   :  { %744 = vsyncadd [#allocation6], 4294964672 }
  0x48   :  { %745 = dma.done.wait [#allocation9], 1024  }
  0x49   :  { %746 = vsyncadd [#allocation9], 4294966272  ;;  %v755_v0 = vmov 0   ;;  %v756_v1 = vmov 0.0   ;;  %v596_v2 = vld [vmem:[#allocation5] sm:$0xff]   ;;  %v597_v3 = vld [vmem:[#allocation5 + $0x8] sm:$0xff]  }
  0x4a   :  { %203 = vmatprep.subr.bf16.mxu0 %v755_v0  ;;  %546 = vmatprep.subr.bf16.mxu1 %v756_v1  ;;  %v598_v4 = vld [vmem:[#allocation5 + $0x10] sm:$0xff]   ;;  %v599_v5 = vld [vmem:[#allocation5 + $0x18] sm:$0xff]   ;;  %vm195_vm0 = vcmask 588800   ;;  %v611_v8 = vld [vmem:[#allocation7] sm:$0xff]   ;;  %vm199_vm1 = vcmask 1043456   ;;  %vm757_vm2 = vmmov 0  }
  0x4b   :  { %204 = vmatpush1.bf16.msra.mxu0 %v596_v2  ;;  %v81_v6 = vld [vmem:[#allocation2] sm:$0xff]  ;;  %v600_v9 = vld [vmem:[#allocation5 + $0x20] sm:$0xff]   ;;  %547 = vmatpush3.bf16.msra.mxu1 %v611_v8  ;;  %v612_v10 = vld [vmem:[#allocation7 + $0x8] sm:$0xff]  }
  0x4c   :  { %205 = vmatprep.subr.bf16.mxu0 %v755_v0  ;;  %v495_v7 = vcombine.high %v81_v6, %v81_v6  ;;  %548 = vmatprep.subr.bf16.mxu1 %v756_v1  ;;  %v601_v11 = vld [vmem:[#allocation5 + $0x28] sm:$0xff]   ;;  %v613_v12 = vld [vmem:[#allocation7 + $0x10] sm:$0xff]   ;;  %v614_v14 = vld [vmem:[#allocation7 + $0x18] sm:$0xff]   ;;  %v494_v24 = vcombine.low %v81_v6, %v81_v6 }
  0x4d   :  { %v602_v13 = vld [vmem:[#allocation5 + $0x30] sm:$0xff]   ;;  %v603_v15 = vld [vmem:[#allocation5 + $0x38] sm:$0xff]   ;;  %v615_v16 = vld [vmem:[#allocation7 + $0x20] sm:$0xff]   ;;  %562 = vmatprep.mubr.msk.bf16.mxu1 %vm757_vm2, %v756_v1 }
  0x4e   :  { %509 = vmatprep.mubr.msk.bf16.mxu0 %vm195_vm0, %v495_v7  ;;  %v604_v17 = vld [vmem:[#allocation5 + $0x40] sm:$0xff]   ;;  %v616_v18 = vld [vmem:[#allocation7 + $0x28] sm:$0xff]   ;;  %v607_v21 = vld [vmem:[#allocation5 + $0x58] sm:$0xff]  }
  0x4f   :  { %206 = vmatpush1.bf16.msra.mxu0 %v597_v3  ;;  %549 = vmatpush3.bf16.msra.mxu1 %v612_v10  ;;  %v605_v19 = vld [vmem:[#allocation5 + $0x48] sm:$0xff]   ;;  %v606_v20 = vld [vmem:[#allocation5 + $0x50] sm:$0xff]   ;;  %v608_v22 = vld [vmem:[#allocation5 + $0x60] ss:$0 sps:$4 sm:$0xff]  }
  0x50   :  { %207 = vmatprep.subr.bf16.mxu0 %v755_v0  ;;  %550 = vmatprep.subr.bf16.mxu1 %v756_v1  ;;  %v201_v23 = vsel %vm199_vm1, %v608_v22, 0  ;;  %v617_v25 = vld [vmem:[#allocation7 + $0x30] sm:$0xff]   ;;  %v618_v26 = vld [vmem:[#allocation7 + $0x38] sm:$0xff]   ;;  %v619_v34 = vld [vmem:[#allocation8] sm:$0xff]  }
  0x51   :  { %v493_v27 = vld [vmem:[%s897_s2] ss:$0 sm:$0xff]  ;;  %v620_v36 = vld [vmem:[#allocation8 + $0x8] sm:$0xff]   ;;  %v622_v38 = vld [vmem:[#allocation8 + $0x18] sm:$0xff]  }
  0x52   :  { %v621_v37 = vld [vmem:[#allocation8 + $0x10] sm:$0xff]   ;;  %v623_v39 = vld [vmem:[#allocation8 + $0x20] sm:$0xff]   ;;  %v624_v40 = vld [vmem:[#allocation8 + $0x28] sm:$0xff]  }
  0x53   :  { %208 = vmatpush1.bf16.msra.mxu0 %v598_v4  ;;  %551 = vmatpush3.bf16.msra.mxu1 %v613_v12  ;;  %v625_v41 = vld [vmem:[#allocation8 + $0x30] sm:$0xff]   ;;  %v626_v42 = vld [vmem:[#allocation8 + $0x38] sm:$0xff]  }
  0x54   :  { %209 = vmatprep.subr.bf16.mxu0 %v755_v0  ;;  %552 = vmatprep.subr.bf16.mxu1 %v756_v1  ;;  %v510_v43 = vld [vmem:[%s899_s4] ss:$0 sm:$0xff]  ;;  %s758_s4 = smov [#allocation10]  }
  0x55   :  { %v519_v51 = vld [vmem:[%s901_s6] ss:$0 sm:$0xff]  ;;  %s482_s28 = sshll.u32 %s758_s4, 4  ;;  %s483_s28 = int_to_ptr.vmem [resolvable:$true] %s482_s28 }
  0x56   :  { %s719_s29 = scalar_lea.vmem %s483_s28, 128  ;;  %p724_p5 = scmp.lt.s32.totalorder %s483_s28, %s483_s28 }
  0x57   :  { %210 = vmatpush1.bf16.msra.mxu0 %v599_v5  ;;  %553 = vmatpush3.bf16.msra.mxu1 %v614_v14  ;;  %p720_p4 = scmp.ne.s32.totalorder %s483_s28, %s719_s29  ;;  %p725_p6 = scmp.lt.s32.totalorder %s719_s29, %s719_s29 }
  0x58   :  { %211 = vmatprep.subr.bf16.mxu0 %v755_v0  ;;  %554 = vmatprep.subr.bf16.mxu1 %v756_v1 }
  0x59   :  { %p726_p7 = por %p725_p6, %p724_p5 }
  0x5b   :  { %212 = vmatpush1.bf16.msra.mxu0 %v600_v9  ;;  %555 = vmatpush3.bf16.msra.mxu1 %v615_v16  ;;  %p727_p8 = pnand %p726_p7, %p720_p4 }
  0x5c   :  { %213 = vmatprep.subr.bf16.mxu0 %v755_v0  ;;  %556 = vmatprep.subr.bf16.mxu1 %v756_v1 }
  0x5f   :  { %214 = vmatpush1.bf16.msra.mxu0 %v601_v11  ;;  %557 = vmatpush3.bf16.msra.mxu1 %v616_v18 }
  0x60   :  { %215 = vmatprep.subr.bf16.mxu0 %v755_v0  ;;  %558 = vmatprep.subr.bf16.mxu1 %v756_v1 }
  0x63   :  { %216 = vmatpush1.bf16.msra.mxu0 %v602_v13  ;;  %559 = vmatpush3.bf16.msra.mxu1 %v617_v25 }
  0x64   :  { %217 = vmatprep.subr.bf16.mxu0 %v755_v0  ;;  %560 = vmatprep.subr.bf16.mxu1 %v756_v1 }
  0x67   :  { %218 = vmatpush1.bf16.msra.mxu0 %v603_v15  ;;  %561 = vmatpush3.bf16.msra.mxu1 %v618_v26 }
  0x68   :  { %219 = vmatprep.subr.bf16.mxu0 %v755_v0  ;;  %566 = vmatprep.subr.bf16.mxu1 %v756_v1 }
  0x6b   :  { %220 = vmatpush1.bf16.msra.mxu0 %v604_v17 }
  0x6c   :  { %221 = vmatprep.subr.bf16.mxu0 %v755_v0 }
  0x6f   :  { %222 = vmatpush1.bf16.msra.mxu0 %v605_v19 }
  0x70   :  { %223 = vmatprep.subr.bf16.mxu0 %v755_v0 }
  0x73   :  { %224 = vmatpush1.bf16.msra.mxu0 %v606_v20 }
  0x74   :  { %225 = vmatprep.subr.bf16.mxu0 %v755_v0 }
  0x77   :  { %226 = vmatpush1.bf16.msra.mxu0 %v607_v21 }
  0x78   :  { %227 = vmatprep.subr.bf16.mxu0 %v755_v0 }
  0x7b   :  { %228 = vmatpush1.bf16.msra.mxu0 %v201_v23 }
  0x7e   :  { %236 = vmatmul.mubr.bf16.vlgmr.msra.gmra.mrb[0].mxu0 %v494_v24 }
 0x151   :  { %v237_v28 = vpop.f32.mrb[0].mxu0 }
 0x152   :  { %v238_v29 = vadd.f32 %v493_v27, %v237_v28  ;;  %v239_v30 = vpop.f32.mrb[1].mxu0 }
 0x153   :  { %v240_v31 = vpop.f32.mrb[2].mxu0 }
 0x154   :  { %v243_v32 = vmax.f32 %v238_v29, 0.0  ;;  %v241_v33 = vpop.f32.mrb[3].mxu0 }
 0x156   :  { %v244_v35 = vpack.c.bf16 %v243_v32, %v243_v32 }
 0x158   :  { %563 = vmatmul.mubr.bf16.vlgmr.msra.gmra.mrb[0].mxu1 %v244_v35 }
 0x159   :  { %567 = vmatpush3.bf16.msra.mxu1 %v619_v34  ;;  %582 = vmatprep.mubr.msk.bf16.mxu1 %vm757_vm2, %v756_v1 }
 0x15a   :  { %568 = vmatprep.subr.bf16.mxu1 %v756_v1 }
 0x15d   :  { %569 = vmatpush3.bf16.msra.mxu1 %v620_v36 }
 0x15e   :  { %570 = vmatprep.subr.bf16.mxu1 %v756_v1 }
 0x161   :  { %571 = vmatpush3.bf16.msra.mxu1 %v621_v37 }
 0x162   :  { %572 = vmatprep.subr.bf16.mxu1 %v756_v1 }
 0x165   :  { %573 = vmatpush3.bf16.msra.mxu1 %v622_v38 }
 0x166   :  { %574 = vmatprep.subr.bf16.mxu1 %v756_v1 }
 0x169   :  { %575 = vmatpush3.bf16.msra.mxu1 %v623_v39 }
 0x16a   :  { %576 = vmatprep.subr.bf16.mxu1 %v756_v1 }
 0x16d   :  { %577 = vmatpush3.bf16.msra.mxu1 %v624_v40 }
 0x16e   :  { %578 = vmatprep.subr.bf16.mxu1 %v756_v1 }
 0x171   :  { %579 = vmatpush3.bf16.msra.mxu1 %v625_v41 }
 0x172   :  { %580 = vmatprep.subr.bf16.mxu1 %v756_v1 }
 0x175   :  { %581 = vmatpush3.bf16.msra.mxu1 %v626_v42 }
 0x22b   :  { %v350_v44 = vpop.f32.mrb[0].mxu1 }
 0x22c   :  { %v351_v45 = vadd.f32 %v510_v43, %v350_v44  ;;  %v564_v46 = vpop.f32.mrb[1].mxu1 }
 0x22d   :  { %v353_v47 = vpop.f32.mrb[2].mxu1 }
 0x22e   :  { %v356_v48 = vmax.f32 %v351_v45, 0.0  ;;  %v565_v49 = vpop.f32.mrb[3].mxu1 }
 0x230   :  { %v357_v50 = vpack.c.bf16 %v356_v48, %v356_v48 }
 0x232   :  { %583 = vmatmul.mubr.bf16.vlgmr.msra.gmra.mrb[4].mxu1 %v357_v50 }
 0x305   :  { %v463_v52 = vpop.f32.mrb[4].mxu1 }
 0x306   :  { %v464_v53 = vadd.f32 %v519_v51, %v463_v52  ;;  %v584_v54 = vpop.f32.mrb[5].mxu1 }
 0x307   :  { %v466_v55 = vpop.f32.mrb[6].mxu1 }
 0x308   :  { %v469_v56 = vsub.f32 0.0, %v464_v53  ;;  %v585_v57 = vpop.f32.mrb[7].mxu1 }
 0x30a   :  { %v470_v58 = vmul.f32 1.442695, %v469_v56 }
 0x30c   :  { %627 = vpow2.f32 %v470_v58 }
 0x316   :  { %v628_v59 = vpop.eup %627 }
 0x317   :  { %v472_v60 = vadd.f32 1.0, %v628_v59 }
 0x319   :  { %629 = vrcp.f32 %v472_v60 }
 0x323   :  { %v630_v61 = vpop.eup %629 }
 0x324   :  { %475 = vst [vmem:[#allocation10] sm:$0xff] %v630_v61 }
 0x325   :  { %730 = shalt.err (!%p727_p8)
}
 0x326   :  { %s731_s8 = scalar_lea.hbm %s902_s7, 128 }
 0x327   :  { %p732_p9 = scmp.ne.s32.totalorder %s902_s7, %s731_s8  ;;  %p735_p10 = scmp.lt.u32.totalorder %s731_s8, %s902_s7 }
 0x329   :  { %p737_p11 = pnand %p735_p10, %p732_p9 }
 0x32b   :  { %740 = shalt.err (!%p737_p11)
}
 0x32c   :  { %485 = dma.vmem_to_hbm [thread:$0]  %s483_s28, 128, %s902_s7, [#allocation4]  }
 0x32d   :  { %747 = dma.done.wait [#allocation4], 128  }
 0x32e   :  { %748 = vsyncadd [#allocation4], 4294967168 }
 0x32f   :  { %489 = vsyncpa [#allocation3], 1 }
 0x330   :  { %490 = vsyncpa [#allocation6], 1 }
 0x331   :  { %491 = vsyncpa [#allocation9], 1 }
 0x332   :  { %492 = vsyncpa [#allocation4], 1 }

</bundles_post_ra>
